<compile_context>
chip_gen: v6e
topology: v6e:2x2x1
jax: 0.10.0
libtpu: 0.0.40
codegen_flags: <defaults>
</compile_context>

<pallas_src>
import jax
import jax.numpy as jnp
from jax.experimental import pallas as pl
from jax.experimental.pallas import tpu as pltpu


def _round_up(n, m):
    return ((n + m - 1) // m) * m


# ---------------------------------------------------------------------------
# Kernel
# ---------------------------------------------------------------------------
def _anfis_kernel(x_ref, par_ref, out_ref):
    """One batch tile of the whole ANFIS pipeline.

    x_ref:   (F, TB)   inputs; features on sublanes, batch on lanes.
    par_ref: (RP, NP)  per-rule parameters; rules on sublanes (RP = rules
             padded to a multiple of 8).  Columns:
             [mean_a, 1/sigma_a, mean_b, 1/sigma_b, bias, pad_penalty,
              onehot_a(F), onehot_b(F), W(F)]
    out_ref: (1, TB)   lane-dense per-row ANFIS output.
    """
    f_dim = x_ref.shape[0]
    par = par_ref[...]                     # tiny (RP, NP) tile, lives in vregs
    mean_a = par[:, 0:1]
    isig_a = par[:, 1:2]
    mean_b = par[:, 2:3]
    isig_b = par[:, 3:4]
    bias = par[:, 4:5]
    penalty = par[:, 5:6]

    # Feature select + linear consequent on the VPU.  F is tiny and static so
    # this unrolls into a few broadcast multiply/adds; no MXU matmul, no
    # (TB, 3*CP) intermediate slab.
    xa = None
    xb = None
    lin = None
    for f in range(f_dim):
        xf = x_ref[f:f + 1, :]                                   # (1, TB)
        ta = par[:, 6 + f:7 + f] * xf                            # (RP, TB)
        tb = par[:, 6 + f_dim + f:7 + f_dim + f] * xf
        tl = par[:, 6 + 2 * f_dim + f:7 + 2 * f_dim + f] * xf
        xa = ta if xa is None else xa + ta
        xb = tb if xb is None else xb + tb
        lin = tl if lin is None else lin + tl
    lin = lin + bias                                             # (RP, TB)

    # Fused Gaussian memberships per rule: exp(-(za^2 + zb^2)) == mf_a * mf_b.
    # The pad penalty drives unfired / padded rules' strengths to exactly 0
    # (replaces a separate mask multiply).
    za = (xa - mean_a) * isig_a
    zb = (xb - mean_b) * isig_b
    fs = jnp.exp(-(za * za + zb * zb) - penalty)                 # (RP, TB)

    # Normalization folded into one per-row divide:
    #   sum_r lin * fs / den == (sum_r lin * fs) / den
    den = jnp.sum(fs, axis=0, keepdims=True)                     # (1, TB)
    num = jnp.sum(lin * fs, axis=0, keepdims=True)               # (1, TB)
    # NOTE: pl.reciprocal(den, approx=True) would move this to the EUP slot;
    # an exact divide on a single (1, TB) row is already negligible and keeps
    # tight parity with the PyTorch reference.
    out_ref[...] = (num / den).astype(out_ref.dtype)


# ---------------------------------------------------------------------------
# Trace-time parameter plumbing (rule tables, sublane padding)
# ---------------------------------------------------------------------------
def _prep_params(mean, sigma, weights, biases, pad_penalty=1e9):
    """Expand ANFIS parameters into a single (RP, 6+3F) per-rule table.

    mean, sigma: (F, M); weights: (C, F); biases: (C, 1)
    Rule enumeration matches ANFISRuleStrengthLayer's nested pair loop.
    Rules beyond the pair-loop count (and sublane padding) get a large
    penalty so their firing strength is exactly 0, matching the zero-filled
    firing_strength entries of the PyTorch layer.
    """
    mean = jnp.asarray(mean, jnp.float32)
    sigma = jnp.asarray(sigma, jnp.float32)
    weights = jnp.asarray(weights, jnp.float32)
    biases = jnp.asarray(biases, jnp.float32)

    F, M = mean.shape
    C = weights.shape[0]

    i1s, j1s, i2s, j2s = [], [], [], []
    for i1 in range(F):
        for j1 in range(M):
            for i2 in range(i1 + 1, F):
                for j2 in range(M):
                    i1s.append(i1); j1s.append(j1)
                    i2s.append(i2); j2s.append(j2)
    R = len(i1s)
    # Config restriction of the original module: the pair loop writes into a
    # zeros(C) tensor, so it must not overflow it (holds for the F=2 default).
    assert R <= C, "pair-loop rule count exceeds consequent_layer_size"

    RP = _round_up(max(R, 1), 8)          # rules padded to a sublane multiple
    i1a = jnp.array(i1s, jnp.int32); j1a = jnp.array(j1s, jnp.int32)
    i2a = jnp.array(i2s, jnp.int32); j2a = jnp.array(j2s, jnp.int32)
    r = jnp.arange(R)

    def col(vals):
        return jnp.zeros((RP, 1), jnp.float32).at[:R, 0].set(vals)

    mean_a = col(mean[i1a, j1a])
    isig_a = col(1.0 / sigma[i1a, j1a])
    mean_b = col(mean[i2a, j2a])
    isig_b = col(1.0 / sigma[i2a, j2a])
    bias_c = col(biases[:R, 0])
    penalty = jnp.full((RP, 1), pad_penalty, jnp.float32).at[:R, 0].set(0.0)

    onehot_a = jnp.zeros((RP, F), jnp.float32).at[r, i1a].set(1.0)
    onehot_b = jnp.zeros((RP, F), jnp.float32).at[r, i2a].set(1.0)
    w = jnp.zeros((RP, F), jnp.float32).at[:R, :].set(weights[:R, :])

    params = jnp.concatenate(
        [mean_a, isig_a, mean_b, isig_b, bias_c, penalty,
         onehot_a, onehot_b, w], axis=1)                  # (RP, 6 + 3F)
    return params


# ---------------------------------------------------------------------------
# Wrapper
# ---------------------------------------------------------------------------
def anfis_forward(x, mean, sigma, weights, biases, *, block_b=2048):
    """Full ANFIS forward: x (B, F) -> (B, 1)."""
    x = jnp.asarray(x, jnp.float32)
    B, F = x.shape
    params = _prep_params(mean, sigma, weights, biases)
    RP, NP = params.shape

    # Batch tiling: batch lives on lanes, so tiles are multiples of 128.
    B128 = _round_up(B, 128)
    TB = min(_round_up(block_b, 128), B128)
    # Keep >= 2 grid steps when the batch allows so the "parallel" batch axis
    # can shard across v7x's two TensorCores (v5e/v6e: harmless).
    if B128 >= 2 * 128 and TB > B128 // 2:
        TB = _round_up(B128 // 2, 128)
    B_pad = _round_up(B, TB)

    # Transposed, zero-padded input: (F, B_pad), lane-dense over batch.
    x_t = jnp.zeros((F, B_pad), jnp.float32).at[:, :B].set(x.T)

    out = pl.pallas_call(
        _anfis_kernel,
        out_shape=jax.ShapeDtypeStruct((1, B_pad), jnp.float32),
        grid=(B_pad // TB,),
        in_specs=[
            pl.BlockSpec((F, TB), lambda i: (0, i)),    # x: tiled over batch
            pl.BlockSpec((RP, NP), lambda i: (0, 0)),   # params: VMEM-resident
        ],
        out_specs=pl.BlockSpec((1, TB), lambda i: (0, i)),  # lane-dense store
        compiler_params=pltpu.CompilerParams(
            dimension_semantics=("parallel",)),
    )(x_t, params)

    # TODO(synk): PyTorch's `.squeeze()` in the consequent layer would also
    # drop the batch dim when B == 1; we keep the well-defined (B, 1) shape.
    return out[0, :B][:, None]


# ---------------------------------------------------------------------------
# Pure-JAX reference (direct transcription of the PyTorch forward)
# ---------------------------------------------------------------------------
def reference_anfis(x, mean, sigma, weights, biases):
    B, F = x.shape
    M = mean.shape[1]
    C = weights.shape[0]
    mf = jnp.exp(-(((x[:, :, None] - mean[None]) / sigma[None]) ** 2))  # (B,F,M)
    cols = []
    for i1 in range(F):
        for j1 in range(M):
            for i2 in range(i1 + 1, F):
                for j2 in range(M):
                    cols.append(mf[:, i1, j1] * mf[:, i2, j2])
    fs = jnp.stack(cols, axis=1)
    if fs.shape[1] < C:
        fs = jnp.concatenate(
            [fs, jnp.zeros((B, C - fs.shape[1]), fs.dtype)], axis=1)
    nfs = fs / jnp.sum(fs, axis=1, keepdims=True)
    lin = jnp.sum(x[:, None, :] * weights[None, :, :], axis=2) + biases[:, 0][None]
    weighted = lin * nfs
    return jnp.sum(weighted, axis=1, keepdims=True)


if __name__ == "__main__":
    # Module defaults: 2 features, 3 membership functions -> 9 rules.
    B, F, M = 300, 2, 3
    C = M ** F

    key = jax.random.PRNGKey(0)
    k_m, k_s, k_w, k_b, k_x = jax.random.split(key, 5)
    mean = jax.random.uniform(k_m, (F, M), dtype=jnp.float32)
    # Well-conditioned sigmas (module accepts custom sigma params).
    sigma = 0.5 + jax.random.uniform(k_s, (F, M), dtype=jnp.float32)
    weights = jax.random.uniform(k_w, (C, F), dtype=jnp.float32)
    biases = jax.random.uniform(k_b, (C, 1), dtype=jnp.float32)
    x = jax.random.uniform(k_x, (B, F), dtype=jnp.float32,
                           minval=-1.0, maxval=1.0)

    # block_b=128 -> 3-step batch grid on this example (exercises the
    # pipeline + batch padding); the default 2048 is the production setting.
    out = anfis_forward(x, mean, sigma, weights, biases, block_b=128)
    out = jax.block_until_ready(out)

    ref = reference_anfis(x, mean, sigma, weights, biases)
    assert out.shape == (B, 1)
    assert jnp.allclose(out, ref, atol=1e-5, rtol=1e-4)

    print("KERNEL_OK")
</pallas_src>

<mosaic_0001>
module attributes {stable_mosaic.version = 11 : i64} {
  func.func @_anfis_kernel(%arg0: i32, %arg1: memref<2x128xf32, #tpu.memory_space<vmem>>, %arg2: memref<16x12xf32, #tpu.memory_space<vmem>>, %arg3: memref<1x128xf32, #tpu.memory_space<vmem>>) attributes {dimension_semantics = [#tpu.dimension_semantics<parallel>], iteration_bounds = array<i64: 3>, scalar_prefetch = 0 : i64, scratch_operands = 0 : i64, tpu.core_type = #tpu.core_type<tc>, window_params = [{transform_indices = @transform_0, window_bounds = array<i64: 2, 128>}, {pipeline_mode = #tpu.pipeline_mode<synchronous>, transform_indices = @transform_1, window_bounds = array<i64: 16, 12>}, {transform_indices = @transform_2, window_bounds = array<i64: 1, 128>}]} {
    %c0 = arith.constant 0 : index
    %c0_0 = arith.constant 0 : index
    %0 = vector.load %arg2[%c0, %c0_0] : memref<16x12xf32, #tpu.memory_space<vmem>>, vector<16x12xf32>
    %1 = vector.extract_strided_slice %0 {offsets = [0, 0], sizes = [16, 1], strides = [1, 1]} : vector<16x12xf32> to vector<16x1xf32>
    %2 = vector.extract_strided_slice %0 {offsets = [0, 1], sizes = [16, 1], strides = [1, 1]} : vector<16x12xf32> to vector<16x1xf32>
    %3 = vector.extract_strided_slice %0 {offsets = [0, 2], sizes = [16, 1], strides = [1, 1]} : vector<16x12xf32> to vector<16x1xf32>
    %4 = vector.extract_strided_slice %0 {offsets = [0, 3], sizes = [16, 1], strides = [1, 1]} : vector<16x12xf32> to vector<16x1xf32>
    %5 = vector.extract_strided_slice %0 {offsets = [0, 4], sizes = [16, 1], strides = [1, 1]} : vector<16x12xf32> to vector<16x1xf32>
    %6 = vector.extract_strided_slice %0 {offsets = [0, 5], sizes = [16, 1], strides = [1, 1]} : vector<16x12xf32> to vector<16x1xf32>
    %c0_1 = arith.constant 0 : index
    %c0_2 = arith.constant 0 : index
    %7 = vector.load %arg1[%c0_1, %c0_2] : memref<2x128xf32, #tpu.memory_space<vmem>>, vector<1x128xf32>
    %8 = vector.extract_strided_slice %0 {offsets = [0, 6], sizes = [16, 1], strides = [1, 1]} : vector<16x12xf32> to vector<16x1xf32>
    %9 = vector.broadcast %8 : vector<16x1xf32> to vector<16x128xf32>
    %10 = vector.broadcast %7 : vector<1x128xf32> to vector<16x128xf32>
    %11 = arith.mulf %9, %10 : vector<16x128xf32>
    %12 = vector.extract_strided_slice %0 {offsets = [0, 8], sizes = [16, 1], strides = [1, 1]} : vector<16x12xf32> to vector<16x1xf32>
    %13 = vector.broadcast %12 : vector<16x1xf32> to vector<16x128xf32>
    %14 = vector.broadcast %7 : vector<1x128xf32> to vector<16x128xf32>
    %15 = arith.mulf %13, %14 : vector<16x128xf32>
    %16 = vector.extract_strided_slice %0 {offsets = [0, 10], sizes = [16, 1], strides = [1, 1]} : vector<16x12xf32> to vector<16x1xf32>
    %17 = vector.broadcast %16 : vector<16x1xf32> to vector<16x128xf32>
    %18 = vector.broadcast %7 : vector<1x128xf32> to vector<16x128xf32>
    %19 = arith.mulf %17, %18 : vector<16x128xf32>
    %c1 = arith.constant 1 : index
    %c0_3 = arith.constant 0 : index
    %20 = vector.load %arg1[%c1, %c0_3] : memref<2x128xf32, #tpu.memory_space<vmem>>, vector<1x128xf32>
    %21 = vector.extract_strided_slice %0 {offsets = [0, 7], sizes = [16, 1], strides = [1, 1]} : vector<16x12xf32> to vector<16x1xf32>
    %22 = vector.broadcast %21 : vector<16x1xf32> to vector<16x128xf32>
    %23 = vector.broadcast %20 : vector<1x128xf32> to vector<16x128xf32>
    %24 = arith.mulf %22, %23 : vector<16x128xf32>
    %25 = vector.extract_strided_slice %0 {offsets = [0, 9], sizes = [16, 1], strides = [1, 1]} : vector<16x12xf32> to vector<16x1xf32>
    %26 = vector.broadcast %25 : vector<16x1xf32> to vector<16x128xf32>
    %27 = vector.broadcast %20 : vector<1x128xf32> to vector<16x128xf32>
    %28 = arith.mulf %26, %27 : vector<16x128xf32>
    %29 = vector.extract_strided_slice %0 {offsets = [0, 11], sizes = [16, 1], strides = [1, 1]} : vector<16x12xf32> to vector<16x1xf32>
    %30 = vector.broadcast %29 : vector<16x1xf32> to vector<16x128xf32>
    %31 = vector.broadcast %20 : vector<1x128xf32> to vector<16x128xf32>
    %32 = arith.mulf %30, %31 : vector<16x128xf32>
    %33 = arith.addf %11, %24 : vector<16x128xf32>
    %34 = arith.addf %15, %28 : vector<16x128xf32>
    %35 = arith.addf %19, %32 : vector<16x128xf32>
    %36 = vector.broadcast %5 : vector<16x1xf32> to vector<16x128xf32>
    %37 = arith.addf %35, %36 : vector<16x128xf32>
    %38 = vector.broadcast %1 : vector<16x1xf32> to vector<16x128xf32>
    %39 = arith.subf %33, %38 : vector<16x128xf32>
    %40 = vector.broadcast %2 : vector<16x1xf32> to vector<16x128xf32>
    %41 = arith.mulf %39, %40 : vector<16x128xf32>
    %42 = vector.broadcast %3 : vector<16x1xf32> to vector<16x128xf32>
    %43 = arith.subf %34, %42 : vector<16x128xf32>
    %44 = vector.broadcast %4 : vector<16x1xf32> to vector<16x128xf32>
    %45 = arith.mulf %43, %44 : vector<16x128xf32>
    %46 = arith.mulf %41, %41 : vector<16x128xf32>
    %47 = arith.mulf %45, %45 : vector<16x128xf32>
    %48 = arith.addf %46, %47 : vector<16x128xf32>
    %cst = arith.constant 0.000000e+00 : f32
    %49 = vector.broadcast %cst : f32 to vector<16x128xf32>
    %50 = arith.subf %49, %48 : vector<16x128xf32>
    %51 = vector.broadcast %6 : vector<16x1xf32> to vector<16x128xf32>
    %52 = arith.subf %50, %51 : vector<16x128xf32>
    %53 = math.exp %52 : vector<16x128xf32>
    %cst_4 = arith.constant dense<0.000000e+00> : vector<128xf32>
    %54 = vector.multi_reduction <add>, %53, %cst_4 [0] : vector<16x128xf32> to vector<128xf32>
    %55 = vector.shape_cast %54 : vector<128xf32> to vector<1x128xf32>
    %56 = arith.mulf %37, %53 : vector<16x128xf32>
    %cst_5 = arith.constant dense<0.000000e+00> : vector<128xf32>
    %57 = vector.multi_reduction <add>, %56, %cst_5 [0] : vector<16x128xf32> to vector<128xf32>
    %58 = vector.shape_cast %57 : vector<128xf32> to vector<1x128xf32>
    %59 = arith.divf %58, %55 : vector<1x128xf32>
    %c0_6 = arith.constant 0 : index
    %c0_7 = arith.constant 0 : index
    %60 = vector.load %arg3[%c0_6, %c0_7] : memref<1x128xf32, #tpu.memory_space<vmem>>, vector<1x128xf32>
    tpu.vector_store %arg3[%c0_6, %c0_7], %59 {strides = array<i32>} : memref<1x128xf32, #tpu.memory_space<vmem>>, vector<1x128xf32>,
    return
  }
  func.func @transform_0(%arg0: i32) -> (i32, i32) {
    %c0_i32 = arith.constant 0 : i32
    %c0_i32_0 = arith.constant 0 : i32
    return %c0_i32, %arg0 : i32, i32
  }
  func.func @transform_1(%arg0: i32) -> (i32, i32) {
    %c0_i32 = arith.constant 0 : i32
    %c0_i32_0 = arith.constant 0 : i32
    %c0_i32_1 = arith.constant 0 : i32
    return %c0_i32, %c0_i32_0 : i32, i32
  }
  func.func @transform_2(%arg0: i32) -> (i32, i32) {
    %c0_i32 = arith.constant 0 : i32
    %c0_i32_0 = arith.constant 0 : i32
    return %c0_i32, %arg0 : i32, i32
  }
}

</mosaic_0001>

<bundles_post_ra>
// kernel: tpu_custom_call.1
= control target key start
LH: loop header
LB: loop body
LE: loop exit
PB: predicated region body
PF: predicated region fallthrough
CT: control target
= control target key end

     0   :  { %7 = vsyncpa [#allocation3], 0  ;;  %s857_s0 = inlined_call_operand.hbm [shape: f32[2,384], index: 0, kind: input, shape index: {}]   ;;  %s858_s1 = inlined_call_operand.hbm [shape: f32[16,12], index: 1, kind: input, shape index: {}]   ;;  %s859_s2 = inlined_call_operand.hbm [shape: f32[1,384], index: 2, kind: output, shape index: {}]  }
   0x1   :  { %9 = vsyncpa [#allocation3 + $0x1], 0 }
   0x2   :  { %10 = vsyncpa [#allocation6], 0 }
   0x3   :  { %11 = vsyncpa [#allocation4], 0 }
   0x4   :  { %13 = vsyncpa [#allocation4 + $0x1], 0  ;;  %s700_s9 = smov 0   ;;  %s702_s10 = smov 0  }
   0x5   :  { %s704_s11 = smov 0   ;;  %s706_s12 = smov 0  }
   0x6 LB: > { %s721_s13 = sadd.s32 4294967295, %s666_s12   ;;  %s433_s14 = sadd.s32 4294967294, %s666_s12   ;;  %s666_s12 = sphi %s706_s12, %s880_s12   ;;  %s662_s11 = sphi %s704_s11, %s879_s11   ;;  %s658_s10 = sphi %s702_s10, %s878_s10   ;;  %s654_s9 = sphi %s700_s9, %s877_s9  }
   0x7   : > { %p39_p0 = scmp.ne.s32.totalorder %s658_s10, %s654_s9  ;;  %p860_p1 = scmp.eq.s32.totalorder %s721_s13, 0 }
   0x8   : > { %p90_p3 = scmp.eq.s32.totalorder %s433_s14, 2  ;;  %p434_p5 = scmp.ge.s32.totalorder %s666_s12, 1 }
   0x9   : > { %p730_p4 = por %p860_p1, %p39_p0  ;;  %p97_p7 = scmp.lt.s32.totalorder %s666_s12, 4 }
   0xa   : > { %p735_p6 = por %p90_p3, %p39_p0  ;;  %s668_s18 = smov [#allocation5]  }
   0xb   : > { %s864_s15 = scalar_select %p730_p4, 1, 0 }
   0xc   : > { %s865_s16 = scalar_select %p735_p6, 1, 0 }
   0xd   : > { %p740_p8 = pnand %p434_p5, %p97_p7  ;;  %s109_s19 = sshll.u32 %s668_s18, 4  ;;  %s110_s19 = int_to_ptr.vmem [resolvable:$true] %s109_s19 }
   0xe   : > { %s753_s21 = sadd.s32 1, %s666_s12   ;;  %s26_s22 = sadd.s32 1, %s662_s11 }
   0xf   : > { %s866_s17 = scalar_select %p740_p8, 1, 0 }
  0x10   : > { %p455_p9 = pneg %p740_p8  ;;  %s23_s23 = ssub.s32 %s666_s12, %s753_s21 }
  0x11   : > { %s555_s24 = scalar_lea.vmem %s110_s19, 256  ;;  %p563_p3 = scmp.lt.s32.totalorder %s110_s19, %s110_s19 }
  0x12   : > { %p748_p10 = pnand %p455_p9, %p860_p1  ;;  %p556_p12 = scmp.ne.s32.totalorder %s110_s19, %s555_s24 }
  0x13   : > { %p564_p5 = scmp.lt.s32.totalorder %s555_s24, %s555_s24 }
  0x14   : > { %p546_p11 = pneg %p748_p10 }
  0x15   : > { %p565_p7 = por %p564_p5, %p563_p3 }
  0x16   : > { %p558_p13 = pnand %p556_p12, %p546_p11 }
  0x18   : > { %p559_p0 = pneg %p558_p13 }
  0x1a   : > { %p566_p2 = pnand %p565_p7, %p559_p0 }
  0x1c   : > { %569 = shalt.err (!%p566_p2)
}
  0x1d   : > { %s669_s25 = smov 128   ;;  %s670_s26 = smov 8  }
  0x1e   : > { %458 = dma.hbm_to_vmem [thread:$0]  (!%p748_p10), %s858_s1, 256, %s110_s19, [#allocation6], %s669_s25, %s669_s25, %s670_s26  }
  0x1f   : > { %p24_p9 = scmp.eq.s32.totalorder %s23_s23, 0  ;;  %p33_p11 = scmp.ne.s32.totalorder %s662_s11, %s658_s10 }
  0x20   : > { %p34_p12 = scmp.eq.s32.totalorder %s666_s12, 0  ;;  %p468_p2 = scmp.lt.s32.totalorder %s666_s12, 3 }
  0x21   : > { %s770_s29 = scalar_select %p24_p9, %s662_s11, %s26_s22  }
  0x22   : > { %p35_p13 = por %p34_p12, %p33_p11  ;;  %p868_p0 = scmp.eq.s32.totalorder %s721_s13, 2 }
  0x23   : > { %s123_s3 = sand.u32 1, %s662_s11   ;;  %s438_s4 = sshll.u32 %s666_s12, 5 }
  0x24   : > { %p774_p3 = por %p868_p0, %p33_p11  ;;  %s437_s5 = sshll.u32 %s123_s3, 1 }
  0x25   : > { %s783_s8 = scalar_lea.hbm %s857_s0, %s438_s4  ;;  %s127_s14 = scalar_lea.vmem [#allocation2], %s437_s5 }
  0x26   : > { %s869_s30 = scalar_select %p774_p3, 1, 0 }
  0x27   : > { %s134_s18 = sshll.u32 %s127_s14, 4  ;;  %p785_p10 = pnand %p468_p2, %p35_p13  ;;  %s135_s18 = int_to_ptr.vmem [resolvable:$true] %s134_s18 }
  0x28   : > { %s124_s20 = scalar_lea.sflag [#allocation3], %s123_s3  ;;  %s570_s22 = scalar_lea.hbm %s783_s8, 32 }
  0x29   : > { %p571_p5 = scmp.ne.s32.totalorder %s783_s8, %s570_s22  ;;  %p572_p7 = pneg %p785_p10 }
  0x2a   : > { %s575_s25 = scalar_lea.hbm %s857_s0, 96  ;;  %p576_p12 = scmp.lt.s32.totalorder %s783_s8, %s857_s0 }
  0x2b   : > { %p573_p9 = pnand %p572_p7, %p571_p5  ;;  %p577_p2 = scmp.lt.s32.totalorder %s575_s25, %s570_s22 }
  0x2d   : > { %p574_p11 = pneg %p573_p9  ;;  %p578_p13 = por %p577_p2, %p576_p12 }
  0x2f   : > { %p579_p0 = pnand %p578_p13, %p574_p11 }
  0x31   : > { %582 = shalt.err (!%p579_p0)
}
  0x32   : > { %s583_s28 = scalar_lea.vmem %s135_s18, 32  ;;  %s671_s3 = smov [#allocation2]  }
  0x33   : > { %p584_p1 = scmp.ne.s32.totalorder %s135_s18, %s583_s28  ;;  %s588_s4 = sshll.u32 %s671_s3, 4  ;;  %s589_s4 = int_to_ptr.vmem [resolvable:$false] %s588_s4 }
  0x34   : > { %s590_s5 = scalar_lea.vmem %s589_s4, 64  ;;  %p591_p5 = scmp.lt.s32.totalorder %s135_s18, %s589_s4 }
  0x35   : > { %p586_p6 = pnand %p584_p1, %p572_p7  ;;  %p592_p9 = scmp.lt.s32.totalorder %s590_s5, %s583_s28 }
  0x37   : > { %p587_p3 = pneg %p586_p6  ;;  %p593_p4 = por %p592_p9, %p591_p5 }
  0x39   : > { %p594_p8 = pnand %p593_p4, %p587_p3 }
  0x3b   : > { %597 = shalt.err (!%p594_p8)
}
  0x3c   : > { %462 = dma.hbm_to_vmem [thread:$0]  (!%p785_p10), %s783_s8, 32, %s135_s18, %s124_s20  }
  0x3d   : > { %p871_p11 = scmp.ne.s32.totalorder %s866_s17, 0 }
  0x3e   : > { %s806_s6 = sand.u32 (!%p871_p11), 1, %s658_s10   ;;  %p872_p1 = scmp.ne.s32.totalorder (!%p871_p11), %s864_s15, 0 }
  0x3f   : > { %143 = sbr.rel (%p871_p11) target bundleno = 309 (0x135), region = 28  ;;  %s440_s7 = sshll.u32 (!%p871_p11), %s806_s6, 1 }
  0x40   : > { %s146_s14 = scalar_lea.sflag (!%p871_p11), [#allocation3], %s806_s6  ;;  %s810_s22 = scalar_lea.vmem (!%p871_p11), [#allocation2], %s440_s7 }
  0x44   : > { %641 = dma.done.wait (%p872_p1), %s146_s14, 32  }
  0x45   : > { %643 = vsyncadd (%p872_p1), %s146_s14, 4294967264  ;;  %p873_p4 = scmp.eq.s32.totalorder %s721_s13, 0 }
  0x47   : > { %645 = dma.done.wait (%p873_p4), [#allocation6], 256   ;;  %p874_p6 = pmov %p873_p4 }
  0x48   : > { %v672_v0 = vmov 8   ;;  %v673_v1 = vmov 6   ;;  %v173_v2 = vld [vmem:[#allocation5] sm:$0xff]  ;;  %v174_v3 = vld [vmem:[#allocation5 + $0x8] sm:$0xff]  ;;  %v674_v4 = vmov 7   ;;  %v675_v5 = vmov 9  }
  0x49   : > { %647 = vsyncadd (%p874_p6), [#allocation6], 4294967040  ;;  %519 = vset.pattern.permute.xlu1 %v672_v0  ;;  %518 = vset.pattern.permute.xlu0 %v673_v1  ;;  %v676_v6 = vmov 0   ;;  %v677_v7 = vmov 2   ;;  %v678_v8 = vmov 1   ;;  %v679_v9 = vmov 5  }
  0x4a   : > { %193 = vperm.xlu1 %519, %v173_v2   ;;  %178 = vperm.xlu0 %518, %v173_v2   ;;  %v680_v10 = vmov 10   ;;  %v681_v11 = vmov 3   ;;  %v682_v12 = vmov 4   ;;  %v683_v13 = vmov 11   ;;  %v442_v23 = vld [vmem:[%s810_s22] ss:$0 sm:$0xff] }
  0x4b   : > { %v443_v24 = vld [vmem:[%s810_s22 + $0x1] ss:$0 sm:$0xff]  ;;  %s444_s15 = sshll.u32 %s721_s13, 4  ;;  %s172_s17 = scalar_lea.vmem [#allocation7], %s806_s6 }
  0x4c   : > { %s357_s8 = sshll.u32 %s172_s17, 4  ;;  %s355_s20 = scalar_lea.hbm %s859_s2, %s444_s15  ;;  %s358_s8 = int_to_ptr.vmem [resolvable:$true] %s357_s8 }
  0x4d   : > { %s345_s23 = scalar_lea.sflag [#allocation4], %s806_s6  ;;  %s598_s24 = scalar_lea.vmem %s358_s8, 16 }
  0x4e   : > { %197 = vperm.xlu1 %519, %v174_v3   ;;  %183 = vperm.xlu0 %518, %v174_v3   ;;  %p599_p8 = scmp.ne.s32.totalorder %s358_s8, %s598_s24  ;;  %p875_p3 = scmp.ne.s32.totalorder %s869_s30, 0 }
  0x4f   : > { %s684_s25 = smov [#allocation7]  }
  0x50   : > { %p600_p10 = pnand %p599_p8, %p875_p3  ;;  %s602_s26 = sshll.u32 %s684_s25, 4  ;;  %s603_s26 = int_to_ptr.vmem [resolvable:$false] %s602_s26 }
  0x51   : > { %s604_s13 = scalar_lea.vmem %s603_s26, 32  ;;  %p605_p12 = scmp.lt.s32.totalorder %s358_s8, %s603_s26 }
  0x52   : > { %521 = vset.pattern.permute.xlu1 %v674_v4  ;;  %520 = vset.pattern.permute.xlu0 %v674_v4  ;;  %p601_p7 = pneg %p600_p10  ;;  %p606_p2 = scmp.lt.s32.totalorder %s604_s13, %s598_s24 }
  0x53   : > { %218 = vperm.xlu1 %521, %v174_v3   ;;  %214 = vperm.xlu0 %520, %v173_v2  }
  0x54   : > { %p607_p13 = por %p606_p2, %p605_p12 }
  0x56   : > { %p608_p0 = pnand %p607_p13, %p601_p7 }
  0x57   : > { %522 = vset.pattern.permute.xlu1 %v675_v5  ;;  %523 = vset.pattern.permute.xlu0 %v675_v5 }
  0x58   : > { %228 = vperm.xlu1 %522, %v173_v2   ;;  %232 = vperm.xlu0 %523, %v174_v3  }
  0x5c   : > { %524 = vset.pattern.permute.xlu1 %v676_v6  ;;  %525 = vset.pattern.permute.xlu0 %v677_v7 }
  0x5d   : > { %264 = vperm.xlu1 %524, %v173_v2   ;;  %284 = vperm.xlu0 %525, %v173_v2  }
  0x61   : > { %268 = vperm.xlu1 %524, %v174_v3   ;;  %528 = vset.pattern.permute.xlu0 %v678_v8 }
  0x62   : > { %278 = vperm.xlu0 %528, %v174_v3  }
  0x65   : > { %526 = vset.pattern.permute.xlu1 %v677_v7 }
  0x66   : > { %288 = vperm.xlu1 %526, %v174_v3   ;;  %530 = vset.pattern.permute.xlu0 %v679_v9 }
  0x67   : > { %312 = vperm.xlu0 %530, %v173_v2  }
  0x6a   : > { %527 = vset.pattern.permute.xlu1 %v678_v8 }
  0x6b   : > { %274 = vperm.xlu1 %527, %v173_v2   ;;  %533 = vset.pattern.permute.xlu0 %v680_v10 }
  0x6c   : > { %207 = vperm.xlu0 %533, %v174_v3  }
  0x6f   : > { %529 = vset.pattern.permute.xlu1 %v681_v11 }
  0x70   : > { %294 = vperm.xlu1 %529, %v173_v2   ;;  %535 = vset.pattern.permute.xlu0 %v682_v12 }
  0x71   : > { %254 = vperm.xlu0 %535, %v173_v2  }
  0x74   : > { %298 = vperm.xlu1 %529, %v174_v3  }
  0x75   : > { %537 = vset.pattern.permute.xlu0 %v679_v9 }
  0x78   : > { %531 = vset.pattern.permute.xlu1 %v679_v9 }
  0x79   : > { %316 = vperm.xlu1 %531, %v174_v3  }
  0x7d   : > { %532 = vset.pattern.permute.xlu1 %v680_v10 }
  0x7e   : > { %203 = vperm.xlu1 %532, %v173_v2  }
  0x82   : > { %534 = vset.pattern.permute.xlu1 %v683_v13 }
  0x83   : > { %238 = vperm.xlu1 %534, %v173_v2  }
  0x87   : > { %242 = vperm.xlu1 %534, %v174_v3  }
  0x8b   : > { %536 = vset.pattern.permute.xlu1 %v682_v12 }
  0x8c   : > { %258 = vperm.xlu1 %536, %v174_v3  }
  0xc5   : > { %v194_v14 = vpop.permute.xlu1 %193  ;;  %v179_v17 = vpop.permute.xlu0 %178 }
  0xc6   : > { %v190_v25 = vmul.f32 %v442_v23, %v179_v17  ;;  %v200_v30 = vmul.f32 %v442_v23, %v194_v14 }
  0xc9   : > { %v198_v15 = vpop.permute.xlu1 %197  ;;  %v184_v19 = vpop.permute.xlu0 %183 }
  0xca   : > { %v191_v31 = vmul.f32 %v442_v23, %v184_v19  ;;  %v201_v40 = vmul.f32 %v442_v23, %v198_v15 }
  0xce   : > { %v219_v16 = vpop.permute.xlu1 %218  ;;  %v215_v21 = vpop.permute.xlu0 %214 }
  0xcf   : > { %v225_v26 = vmul.f32 %v443_v24, %v215_v21  ;;  %v226_v32 = vmul.f32 %v443_v24, %v219_v16 }
  0xd1   : > { %v247_v33 = vadd.f32 %v225_v26, %v190_v25  ;;  %v248_v39 = vadd.f32 %v226_v32, %v191_v31 }
  0xd3   : > { %v229_v18 = vpop.permute.xlu1 %228  ;;  %v233_v27 = vpop.permute.xlu0 %232 }
  0xd4   : > { %v235_v29 = vmul.f32 %v443_v24, %v229_v18  ;;  %v236_v37 = vmul.f32 %v443_v24, %v233_v27 }
  0xd6   : > { %v249_v34 = vadd.f32 %v235_v29, %v200_v30  ;;  %v250_v46 = vadd.f32 %v236_v37, %v201_v40 }
  0xd8   : > { %v265_v20 = vpop.permute.xlu1 %264  ;;  %v285_v36 = vpop.permute.xlu0 %284 }
  0xd9   : > { %v271_v38 = vsub.f32 %v247_v33, %v265_v20  ;;  %v291_v41 = vsub.f32 %v249_v34, %v285_v36 }
  0xdc   : > { %v269_v22 = vpop.permute.xlu1 %268 }
  0xdd   : > { %v272_v42 = vsub.f32 %v248_v39, %v269_v22  ;;  %v279_v44 = vpop.permute.xlu0 %278 }
  0xdf   : > { %v282_v48 = vmul.f32 %v279_v44, %v272_v42 }
  0xe1   : > { %v289_v28 = vpop.permute.xlu1 %288  ;;  %v304_v56 = vmul.f32 %v282_v48, %v282_v48 }
  0xe2   : > { %v292_v49 = vsub.f32 %v250_v46, %v289_v28  ;;  %v313_v55 = vpop.permute.xlu0 %312 }
  0xe6   : > { %v275_v35 = vpop.permute.xlu1 %274 }
  0xe7   : > { %v281_v43 = vmul.f32 %v275_v35, %v271_v38  ;;  %v208_v3 = vpop.permute.xlu0 %207 }
  0xe8   : > { %v211_v7 = vmul.f32 %v442_v23, %v208_v3 }
  0xe9   : > { %v303_v50 = vmul.f32 %v281_v43, %v281_v43 }
  0xeb   : > { %v295_v45 = vpop.permute.xlu1 %294 }
  0xec   : > { %v301_v47 = vmul.f32 %v295_v45, %v291_v41  ;;  %v255_v11 = vpop.permute.xlu0 %254 }
  0xee   : > { %v305_v51 = vmul.f32 %v301_v47, %v301_v47 }
  0xef   : > { %v299_v52 = vpop.permute.xlu1 %298 }
  0xf0   : > { %v302_v53 = vmul.f32 %v299_v52, %v292_v49  ;;  %v307_v54 = vadd.f32 %v305_v51, %v303_v50 }
  0xf2   : > { %v306_v57 = vmul.f32 %v302_v53, %v302_v53  ;;  %v309_v58 = vsub.f32 0.0, %v307_v54 }
  0xf4   : > { %v319_v59 = vsub.f32 %v309_v58, %v313_v55  ;;  %v317_v60 = vpop.permute.xlu1 %316  ;;  %v308_v61 = vadd.f32 %v306_v57, %v304_v56 }
  0xf6   : > { %v321_v62 = vmul.f32 1.442695, %v319_v59  ;;  %v310_v63 = vsub.f32 0.0, %v308_v61 }
  0xf8   : > { %v320_v0 = vsub.f32 %v310_v63, %v317_v60  ;;  %538 = vpow2.f32 %v321_v62 }
  0xf9   : > { %v204_v1 = vpop.permute.xlu1 %203 }
  0xfa   : > { %v323_v2 = vmul.f32 1.442695, %v320_v0  ;;  %v210_v4 = vmul.f32 %v442_v23, %v204_v1 }
  0xfc   : > { %540 = vpow2.f32 %v323_v2 }
  0xfe   : > { %v239_v5 = vpop.permute.xlu1 %238 }
  0xff   : > { %v245_v6 = vmul.f32 %v443_v24, %v239_v5 }
 0x101   : > { %v251_v9 = vadd.f32 %v245_v6, %v210_v4 }
 0x102   : > { %v243_v8 = vpop.permute.xlu1 %242 }
 0x103   : > { %v246_v10 = vmul.f32 %v443_v24, %v243_v8  ;;  %v261_v13 = vadd.f32 %v255_v11, %v251_v9 }
 0x105   : > { %v252_v12 = vadd.f32 %v246_v10, %v211_v7  ;;  %v539_v14 = vpop.eup %538 }
 0x106   : > { %v332_v19 = vmul.f32 %v539_v14, %v261_v13 }
 0x107   : > { %v259_v15 = vpop.permute.xlu1 %258 }
 0x108   : > { %v262_v16 = vadd.f32 %v259_v15, %v252_v12 }
 0x109   : > { %v541_v17 = vpop.eup %540 }
 0x10a   : > { %v325_v18 = vadd.f32 %v541_v17, %v539_v14  ;;  %v333_v20 = vmul.f32 %v541_v17, %v262_v16 }
 0x10c   : > { %v326_v21 = vrot.slane %v325_v18, 4  ;;  %v334_v22 = vadd.f32 %v333_v20, %v332_v19 }
 0x10e   : > { %v327_v25 = vadd.f32 %v326_v21, %v325_v18  ;;  %v335_v23 = vrot.slane %v334_v22, 4 }
 0x110   : > { %v328_v26 = vrot.slane %v327_v25, 2  ;;  %v336_v24 = vadd.f32 %v335_v23, %v334_v22 }
 0x112   : > { %v329_v27 = vadd.f32 %v328_v26, %v327_v25  ;;  %v337_v30 = vrot.slane %v336_v24, 2 }
 0x114   : > { %v330_v28 = vrot.slane %v329_v27, 1  ;;  %v338_v31 = vadd.f32 %v337_v30, %v336_v24 }
 0x116   : > { %v331_v29 = vadd.f32 %v330_v28, %v329_v27  ;;  %v339_v32 = vrot.slane %v338_v31, 1 }
 0x118   : > { %542 = vrcp.f32 %v331_v29  ;;  %v340_v33 = vadd.f32 %v339_v32, %v338_v31 }
 0x125   : > { %v543_v34 = vpop.eup %542 }
 0x126   : > { %v342_v35 = vmul.f32 %v543_v34, %v340_v33 }
 0x128   : > { %343 = vst [vmem:[%s172_s17] sm:$0x1] %v342_v35 }
 0x129   : > { %611 = shalt.err (!%p608_p0)
}
 0x12a   : > { %s612_s27 = scalar_lea.hbm %s355_s20, 16  ;;  %s616_s4 = scalar_lea.hbm %s859_s2, 48 }
 0x12b   : > { %p613_p5 = scmp.ne.s32.totalorder %s355_s20, %s612_s27  ;;  %p617_p1 = scmp.lt.s32.totalorder %s355_s20, %s859_s2 }
 0x12c   : > { %p618_p4 = scmp.lt.s32.totalorder %s616_s4, %s612_s27 }
 0x12d   : > { %p614_p9 = pnand %p613_p5, %p875_p3 }
 0x12e   : > { %p619_p6 = por %p618_p4, %p617_p1 }
 0x12f   : > { %p615_p11 = pneg %p614_p9 }
 0x131   : > { %p620_p8 = pnand %p619_p6, %p615_p11 }
 0x133   : > { %623 = shalt.err (!%p620_p8)
}
 0x134   : > { %453 = dma.vmem_to_hbm [thread:$0]  (%p875_p3), %s358_s8, 16, %s355_s20, %s345_s23  }
 0x135 PF: > { %p470_p10 = scmp.ge.s32.totalorder %s666_s12, 2  ;;  %s369_s7 = sand.u32 1, %s654_s9  }
 0x136   : > { %p876_p7 = scmp.ne.s32.totalorder %s865_s16, 0  ;;  %s370_s14 = scalar_lea.sflag [#allocation4], %s369_s7 }
 0x138   : > { %p464_p12 = pnand %p470_p10, %p876_p7 }
 0x13a   : > { %p465_p2 = pneg %p464_p12 }
 0x13c   : > { %649 = dma.done.wait (%p465_p2), %s370_s14, 16  }
 0x13d   : > { %651 = vsyncadd (%p465_p2), %s370_s14, 4294967280  ;;  %p16_p13 = scmp.ge.s32.totalorder %s753_s21, 5   ;;  %s877_s9 = smov %s658_s10 }
 0x13e   : > { %s878_s10 = smov %s662_s11  ;;  %s879_s11 = smov %s770_s29 }
 0x13f   : > { %s880_s12 = smov %s753_s21  ;;  %18 = sbr.rel (!%p16_p13) target bundleno = 6 (0x6), region = 77 }
 0x144   :  { %374 = vsyncpa [#allocation3], 1 }
 0x145   :  { %376 = vsyncpa [#allocation3 + $0x1], 1 }
 0x146   :  { %377 = vsyncpa [#allocation6], 1 }
 0x147   :  { %378 = vsyncpa [#allocation4], 1 }
 0x148   :  { %380 = vsyncpa [#allocation4 + $0x1], 1 }

</bundles_post_ra>
